<compile_context>
chip_gen: v6e
topology: v6e:2x2x1
jax: 0.10.0
libtpu: 0.0.40
codegen_flags: <defaults>
</compile_context>

<pallas_src>
import math
import functools

import jax
import jax.numpy as jnp
from jax.experimental import pallas as pl
from jax.experimental.pallas import tpu as pltpu


# ----------------------------------------------------------------------------- kernel

def adaptformer_kernel(x_ref,                # VMEM (TM, Dp)
                       wd_ref, bd_ref,       # VMEM (Dp, Bop), (1, Bop)  (gamma/beta folded)
                       wu_ref, bu_ref,       # VMEM (Bop, Dp), (1, Dp)   (scale folded)
                       o_ref,                # VMEM (TM, Dp)
                       *, true_d, pad_d):
    xf = x_ref[...].astype(jnp.float32)

    # LayerNorm statistics over the TRUE last axis.  Padded lanes of x are zero,
    # so the mean is exact after dividing by true_d; the centered sum-of-squares
    # picks up (Dp - D) * mean^2 from the padded lanes, which we subtract.
    inv_d = 1.0 / true_d
    mean = jnp.sum(xf, axis=-1, keepdims=True) * inv_d
    xc = xf - mean
    s2 = jnp.sum(xc * xc, axis=-1, keepdims=True)
    if pad_d:
        s2 = s2 - float(pad_d) * (mean * mean)
    var = jnp.maximum(s2 * inv_d, 0.0)
    xn = xc * jax.lax.rsqrt(var + 1e-5)
    # (gamma, beta) are pre-folded into W_down / b_down; padded rows of W_down
    # are zero so the garbage values in padded lanes of xn contribute nothing.

    # down_proj + ReLU : feed the MXU operands in the weights' native dtype.
    h = jnp.dot(xn.astype(wd_ref.dtype), wd_ref[...],
                preferred_element_type=jnp.float32)
    h = jnp.maximum(h + bd_ref[...].astype(jnp.float32), 0.0)

    # up_proj (+ bias); adapter scale already folded into W_up / b_up.
    y = jnp.dot(h.astype(wu_ref.dtype), wu_ref[...],
                preferred_element_type=jnp.float32)
    o_ref[...] = (y + bu_ref[...].astype(jnp.float32)).astype(o_ref.dtype)


# ----------------------------------------------------------------------------- wrapper

def _round_up(x, m):
    return ((x + m - 1) // m) * m


def _vmem_budget_and_limit():
    """Per-generation VMEM budget for tiling and the scoped vmem limit."""
    cap = 64 * 1024 * 1024
    try:
        cap = int(getattr(pltpu.get_tpu_info(), "vmem_capacity_bytes", cap))
    except Exception:
        pass
    if cap >= 96 * 1024 * 1024:                       # v5e / v6e (128 MiB physical)
        return 72 * 1024 * 1024, 96 * 1024 * 1024
    return 20 * 1024 * 1024, 32 * 1024 * 1024         # v7x / unknown (64 MiB physical)


def _pick_tm(n_rows, d_pad, bo_pad, itemsize, sublane, vmem_budget):
    """Largest row tile whose footprint (double-buffered x/out tiles, double-
    buffered weights, and the f32 intermediates xf/xc/xn, h, y) fits the budget,
    additionally capped so the grid has >=2 (ideally >=4) steps."""
    # weights / biases, assumed double-buffered (grid-invariant, cheap anyway)
    w_bytes = 2 * (2 * d_pad * bo_pad + 2 * d_pad + 2 * bo_pad) * itemsize
    # per-row: x + out tiles (double-buffered) + f32 temporaries (~3 Dp-wide + h)
    per_row = 4 * d_pad * itemsize + 4 * (3 * d_pad + bo_pad)
    tm = (vmem_budget - w_bytes) // per_row
    tm = min(int(tm), 1024)
    # Keep >=2 grid steps (v7x has 2 TensorCores; ~0.35 us extra elsewhere).
    if n_rows >= 4 * 256:
        tm = min(tm, _round_up(pl.cdiv(n_rows, 4), 256))
    elif n_rows > sublane:
        tm = min(tm, _round_up(pl.cdiv(n_rows, 2), sublane))
    tm = min(tm, _round_up(n_rows, sublane))
    if tm >= 256:
        tm = (tm // 256) * 256                         # MXU-friendly multiple
    else:
        tm = (tm // sublane) * sublane
    return max(sublane, int(tm))


def adaptformer_forward(x, params, *, tm=None):
    """x: (..., in_dim). Returns same shape/dtype."""
    gamma, beta, wd, bd, wu, bu, scale = params
    orig_shape = x.shape
    D = orig_shape[-1]
    Bo = wd.shape[1]
    N = 1
    for s in orig_shape[:-1]:
        N *= s

    # Lane-dense channel dims.  Rows are NOT padded: the partial last grid block
    # is masked by Pallas (garbage rows stay row-local and are never written).
    Dp = _round_up(D, 128)
    Bop = _round_up(Bo, 128)

    itemsize = jnp.dtype(x.dtype).itemsize
    sublane = {4: 8, 2: 16, 1: 32}.get(itemsize, 8)
    budget, vmem_limit = _vmem_budget_and_limit()
    if tm is None:
        tm = _pick_tm(N, Dp, Bop, itemsize, sublane, budget)

    x2 = x.reshape(N, D)
    if Dp != D:
        # Only when in_dim % 128 != 0 (costs one extra pass over x).
        x2 = jnp.pad(x2, ((0, 0), (0, Dp - D)))

    # Fold LayerNorm affine into down_proj, adapter scale into up_proj (host side).
    gamma_f = gamma.astype(jnp.float32).reshape(-1)
    beta_f = beta.astype(jnp.float32).reshape(-1)
    wd_f = wd.astype(jnp.float32)
    scale_f = scale.astype(jnp.float32).reshape(-1)[0]
    wd2 = (gamma_f[:, None] * wd_f).astype(wd.dtype)
    bd2 = (bd.astype(jnp.float32) + beta_f @ wd_f).astype(bd.dtype).reshape(1, -1)
    wu2 = (wu.astype(jnp.float32) * scale_f).astype(wu.dtype)
    bu2 = (bu.astype(jnp.float32) * scale_f).astype(bu.dtype).reshape(1, -1)

    def pad2(a, r, c):
        pr, pc = r - a.shape[0], c - a.shape[1]
        return jnp.pad(a, ((0, pr), (0, pc))) if (pr or pc) else a

    wd2 = pad2(wd2, Dp, Bop)
    bd2 = pad2(bd2, 1, Bop)
    wu2 = pad2(wu2, Bop, Dp)
    bu2 = pad2(bu2, 1, Dp)

    kernel = functools.partial(adaptformer_kernel, true_d=float(D), pad_d=int(Dp - D))

    grid = (pl.cdiv(N, tm),)
    grid_spec = pltpu.PrefetchScalarGridSpec(
        num_scalar_prefetch=0,
        grid=grid,
        in_specs=[
            pl.BlockSpec((tm, Dp), lambda i: (i, 0)),    # x rows (ragged last block masked)
            pl.BlockSpec((Dp, Bop), lambda i: (0, 0)),   # W_down (gamma folded in)
            pl.BlockSpec((1, Bop), lambda i: (0, 0)),    # b_down (beta folded in)
            pl.BlockSpec((Bop, Dp), lambda i: (0, 0)),   # W_up (scale folded in)
            pl.BlockSpec((1, Dp), lambda i: (0, 0)),     # b_up (scale folded in)
        ],
        out_specs=pl.BlockSpec((tm, Dp), lambda i: (i, 0)),
    )

    flops = 4 * N * Dp * Bop + 10 * N * Dp
    bytes_accessed = (2 * N * Dp + 2 * Dp * Bop + 2 * Dp + 2 * Bop) * itemsize

    out = pl.pallas_call(
        kernel,
        out_shape=jax.ShapeDtypeStruct((N, Dp), x.dtype),
        grid_spec=grid_spec,
        compiler_params=pltpu.CompilerParams(
            dimension_semantics=("parallel",),     # v7x: rows sharded across 2 TCs
            vmem_limit_bytes=vmem_limit,
        ),
        cost_estimate=pl.CostEstimate(
            flops=int(flops),
            transcendentals=int(N),
            bytes_accessed=int(bytes_accessed),
        ),
    )(x2, wd2, bd2, wu2, bu2)

    if Dp != D:
        out = out[:, :D]
    return out.reshape(orig_shape)


# ----------------------------------------------------------------------------- params & reference

def init_params(key, in_dim, bottle_dim, dtype=jnp.float32):
    """Deterministic init mirroring AdaptFormer.__init__ semantics."""
    gamma = jnp.ones((in_dim,), dtype)             # LayerNorm weight = 1
    beta = jnp.zeros((in_dim,), dtype)             # LayerNorm bias = 0
    # down_proj: kaiming_normal_(a=sqrt(5)) on (bottle, in); stored transposed.
    a = math.sqrt(5.0)
    gain = math.sqrt(2.0 / (1.0 + a * a))
    std = gain / math.sqrt(in_dim)                 # fan_in = in_dim
    wd = (std * jax.random.normal(key, (in_dim, bottle_dim))).astype(dtype)
    bd = jnp.zeros((bottle_dim,), dtype)
    wu = jnp.zeros((bottle_dim, in_dim), dtype)    # up_proj zero-initialized
    bu = jnp.zeros((in_dim,), dtype)
    scale = jnp.ones((1,), dtype)
    return (gamma, beta, wd, bd, wu, bu, scale)


def random_params(key, in_dim, bottle_dim, dtype=jnp.float32):
    """Non-degenerate parameters (up_proj nonzero) for a meaningful numeric check."""
    k1, k2, k3, k4, k5, k6 = jax.random.split(key, 6)
    gamma = (1.0 + 0.1 * jax.random.normal(k1, (in_dim,))).astype(dtype)
    beta = (0.1 * jax.random.normal(k2, (in_dim,))).astype(dtype)
    wd = (jax.random.normal(k3, (in_dim, bottle_dim)) / math.sqrt(in_dim)).astype(dtype)
    bd = (0.1 * jax.random.normal(k4, (bottle_dim,))).astype(dtype)
    wu = (jax.random.normal(k5, (bottle_dim, in_dim)) / math.sqrt(bottle_dim)).astype(dtype)
    bu = (0.1 * jax.random.normal(k6, (in_dim,))).astype(dtype)
    scale = jnp.array([0.7], dtype)
    return (gamma, beta, wd, bd, wu, bu, scale)


def reference_forward(x, params):
    gamma, beta, wd, bd, wu, bu, scale = params
    xf = x.astype(jnp.float32)
    mean = jnp.mean(xf, axis=-1, keepdims=True)
    var = jnp.mean((xf - mean) ** 2, axis=-1, keepdims=True)
    xn = (xf - mean) * jax.lax.rsqrt(var + 1e-5)
    xn = xn * gamma.astype(jnp.float32) + beta.astype(jnp.float32)
    h = jnp.maximum(xn @ wd.astype(jnp.float32) + bd.astype(jnp.float32), 0.0)
    y = h @ wu.astype(jnp.float32) + bu.astype(jnp.float32)
    return (y * scale.astype(jnp.float32)[0]).astype(x.dtype)


# ----------------------------------------------------------------------------- test

if __name__ == "__main__":
    key = jax.random.PRNGKey(0)
    k_x, k_w, k_x2, k_w2 = jax.random.split(key, 4)

    # 1) Module-faithful init (up_proj zeros -> output is exactly zero).
    batch, seq, in_dim, bottle_dim = 2, 8, 32, 16
    x = jax.random.normal(k_x, (batch, seq, in_dim), dtype=jnp.float32)
    params = init_params(k_w, in_dim, bottle_dim, dtype=jnp.float32)
    out = jax.block_until_ready(adaptformer_forward(x, params))
    ref = reference_forward(x, params)
    assert out.shape == x.shape and out.dtype == x.dtype
    assert jnp.allclose(out, ref, atol=1e-4, rtol=1e-4)

    # 2) Random params + ragged row count (exercises the masked partial row block
    #    and the channel/bottleneck padding paths).
    batch2, seq2 = 3, 7
    x2 = jax.random.normal(k_x2, (batch2, seq2, in_dim), dtype=jnp.float32)
    params2 = random_params(k_w2, in_dim, bottle_dim, dtype=jnp.float32)
    out2 = jax.block_until_ready(adaptformer_forward(x2, params2))
    ref2 = reference_forward(x2, params2)
    assert out2.shape == x2.shape and out2.dtype == x2.dtype
    assert jnp.allclose(out2, ref2, atol=1e-4, rtol=1e-4)

    print("KERNEL_OK")
</pallas_src>

<mosaic_0001>
module attributes {stable_mosaic.version = 11 : i64} {
  func.func @adaptformer_kernel(%arg0: i32, %arg1: memref<8x128xf32, #tpu.memory_space<vmem>>, %arg2: memref<128x128xf32, #tpu.memory_space<vmem>>, %arg3: memref<1x128xf32, #tpu.memory_space<vmem>>, %arg4: memref<128x128xf32, #tpu.memory_space<vmem>>, %arg5: memref<1x128xf32, #tpu.memory_space<vmem>>, %arg6: memref<8x128xf32, #tpu.memory_space<vmem>>) attributes {dimension_semantics = [#tpu.dimension_semantics<parallel>], iteration_bounds = array<i64: 2>, scalar_prefetch = 0 : i64, scratch_operands = 0 : i64, tpu.core_type = #tpu.core_type<tc>, window_params = [{transform_indices = @transform_0, window_bounds = array<i64: 8, 128>}, {pipeline_mode = #tpu.pipeline_mode<synchronous>, transform_indices = @transform_1, window_bounds = array<i64: 128, 128>}, {pipeline_mode = #tpu.pipeline_mode<synchronous>, transform_indices = @transform_2, window_bounds = array<i64: 1, 128>}, {pipeline_mode = #tpu.pipeline_mode<synchronous>, transform_indices = @transform_3, window_bounds = array<i64: 128, 128>}, {pipeline_mode = #tpu.pipeline_mode<synchronous>, transform_indices = @transform_4, window_bounds = array<i64: 1, 128>}, {transform_indices = @transform_5, window_bounds = array<i64: 8, 128>}]} {
    %c0 = arith.constant 0 : index
    %c0_0 = arith.constant 0 : index
    %0 = vector.load %arg1[%c0, %c0_0] : memref<8x128xf32, #tpu.memory_space<vmem>>, vector<8x128xf32>
    %cst = arith.constant dense<0.000000e+00> : vector<8xf32>
    %1 = vector.multi_reduction <add>, %0, %cst [1] : vector<8x128xf32> to vector<8xf32>
    %2 = vector.shape_cast %1 : vector<8xf32> to vector<8x1xf32>
    %cst_1 = arith.constant 3.125000e-02 : f32
    %3 = vector.broadcast %cst_1 : f32 to vector<8x1xf32>
    %4 = arith.mulf %2, %3 : vector<8x1xf32>
    %5 = vector.broadcast %4 : vector<8x1xf32> to vector<8x128xf32>
    %6 = arith.subf %0, %5 : vector<8x128xf32>
    %7 = arith.mulf %6, %6 : vector<8x128xf32>
    %cst_2 = arith.constant dense<0.000000e+00> : vector<8xf32>
    %8 = vector.multi_reduction <add>, %7, %cst_2 [1] : vector<8x128xf32> to vector<8xf32>
    %9 = vector.shape_cast %8 : vector<8xf32> to vector<8x1xf32>
    %10 = arith.mulf %4, %4 : vector<8x1xf32>
    %cst_3 = arith.constant 9.600000e+01 : f32
    %11 = vector.broadcast %cst_3 : f32 to vector<8x1xf32>
    %12 = arith.mulf %11, %10 : vector<8x1xf32>
    %13 = arith.subf %9, %12 : vector<8x1xf32>
    %cst_4 = arith.constant 3.125000e-02 : f32
    %14 = vector.broadcast %cst_4 : f32 to vector<8x1xf32>
    %15 = arith.mulf %13, %14 : vector<8x1xf32>
    %cst_5 = arith.constant 0.000000e+00 : f32
    %16 = vector.broadcast %cst_5 : f32 to vector<8x1xf32>
    %17 = arith.maximumf %15, %16 : vector<8x1xf32>
    %cst_6 = arith.constant 9.99999974E-6 : f32
    %18 = vector.broadcast %cst_6 : f32 to vector<8x1xf32>
    %19 = arith.addf %17, %18 : vector<8x1xf32>
    %20 = math.rsqrt %19 : vector<8x1xf32>
    %21 = vector.broadcast %20 : vector<8x1xf32> to vector<8x128xf32>
    %22 = arith.mulf %6, %21 : vector<8x128xf32>
    %c0_7 = arith.constant 0 : index
    %c0_8 = arith.constant 0 : index
    %23 = vector.load %arg2[%c0_7, %c0_8] : memref<128x128xf32, #tpu.memory_space<vmem>>, vector<128x128xf32>
    %cst_9 = arith.constant dense<0.000000e+00> : vector<8x128xf32>
    %24 = tpu.matmul %22, %23, %cst_9 {dimension_numbers = #tpu.dot_dimension_numbers<[1], [0], [0], [1], [0, 0, 1, 1], [], []>} : vector<8x128xf32>, vector<128x128xf32>, vector<8x128xf32> -> vector<8x128xf32>
    %c0_10 = arith.constant 0 : index
    %c0_11 = arith.constant 0 : index
    %25 = vector.load %arg3[%c0_10, %c0_11] : memref<1x128xf32, #tpu.memory_space<vmem>>, vector<1x128xf32>
    %26 = vector.broadcast %25 : vector<1x128xf32> to vector<8x128xf32>
    %27 = arith.addf %24, %26 : vector<8x128xf32>
    %cst_12 = arith.constant 0.000000e+00 : f32
    %28 = vector.broadcast %cst_12 : f32 to vector<8x128xf32>
    %29 = arith.maximumf %27, %28 : vector<8x128xf32>
    %c0_13 = arith.constant 0 : index
    %c0_14 = arith.constant 0 : index
    %30 = vector.load %arg4[%c0_13, %c0_14] : memref<128x128xf32, #tpu.memory_space<vmem>>, vector<128x128xf32>
    %cst_15 = arith.constant dense<0.000000e+00> : vector<8x128xf32>
    %31 = tpu.matmul %29, %30, %cst_15 {dimension_numbers = #tpu.dot_dimension_numbers<[1], [0], [0], [1], [0, 0, 1, 1], [], []>} : vector<8x128xf32>, vector<128x128xf32>, vector<8x128xf32> -> vector<8x128xf32>
    %c0_16 = arith.constant 0 : index
    %c0_17 = arith.constant 0 : index
    %32 = vector.load %arg5[%c0_16, %c0_17] : memref<1x128xf32, #tpu.memory_space<vmem>>, vector<1x128xf32>
    %33 = vector.broadcast %32 : vector<1x128xf32> to vector<8x128xf32>
    %34 = arith.addf %31, %33 : vector<8x128xf32>
    %c0_18 = arith.constant 0 : index
    %c0_19 = arith.constant 0 : index
    %35 = vector.load %arg6[%c0_18, %c0_19] : memref<8x128xf32, #tpu.memory_space<vmem>>, vector<8x128xf32>
    tpu.vector_store %arg6[%c0_18, %c0_19], %34 {strides = array<i32>} : memref<8x128xf32, #tpu.memory_space<vmem>>, vector<8x128xf32>,
    return
  }
  func.func @transform_0(%arg0: i32) -> (i32, i32) {
    %c0_i32 = arith.constant 0 : i32
    %c0_i32_0 = arith.constant 0 : i32
    return %arg0, %c0_i32 : i32, i32
  }
  func.func @transform_1(%arg0: i32) -> (i32, i32) {
    %c0_i32 = arith.constant 0 : i32
    %c0_i32_0 = arith.constant 0 : i32
    %c0_i32_1 = arith.constant 0 : i32
    return %c0_i32, %c0_i32_0 : i32, i32
  }
  func.func @transform_2(%arg0: i32) -> (i32, i32) {
    %c0_i32 = arith.constant 0 : i32
    %c0_i32_0 = arith.constant 0 : i32
    %c0_i32_1 = arith.constant 0 : i32
    return %c0_i32, %c0_i32_0 : i32, i32
  }
  func.func @transform_3(%arg0: i32) -> (i32, i32) {
    %c0_i32 = arith.constant 0 : i32
    %c0_i32_0 = arith.constant 0 : i32
    %c0_i32_1 = arith.constant 0 : i32
    return %c0_i32, %c0_i32_0 : i32, i32
  }
  func.func @transform_4(%arg0: i32) -> (i32, i32) {
    %c0_i32 = arith.constant 0 : i32
    %c0_i32_0 = arith.constant 0 : i32
    %c0_i32_1 = arith.constant 0 : i32
    return %c0_i32, %c0_i32_0 : i32, i32
  }
  func.func @transform_5(%arg0: i32) -> (i32, i32) {
    %c0_i32 = arith.constant 0 : i32
    %c0_i32_0 = arith.constant 0 : i32
    return %arg0, %c0_i32 : i32, i32
  }
}

</mosaic_0001>

<bundles_post_ra>
// kernel: tpu_custom_call.1
= control target key start
LH: loop header
LB: loop body
LE: loop exit
PB: predicated region body
PF: predicated region fallthrough
CT: control target
= control target key end

     0   :  { %10 = vsyncpa [#allocation3], 0  ;;  %s1184_s0 = inlined_call_operand.hbm [shape: f32[16,128], index: 0, kind: input, shape index: {}]   ;;  %s1185_s1 = inlined_call_operand.hbm [shape: f32[128,128], index: 1, kind: input, shape index: {}]   ;;  %s1186_s2 = inlined_call_operand.vmem [shape: f32[1,128], index: 2, kind: input, shape index: {}]   ;;  %s1187_s3 = inlined_call_operand.hbm [shape: f32[128,128], index: 3, kind: input, shape index: {}]   ;;  %s1188_s4 = inlined_call_operand.vmem [shape: f32[1,128], index: 4, kind: input, shape index: {}]   ;;  %s1189_s5 = inlined_call_operand.hbm [shape: f32[16,128], index: 5, kind: output, shape index: {}]  }
   0x1   :  { %12 = vsyncpa [#allocation3 + $0x1], 0 }
   0x2   :  { %13 = vsyncpa [#allocation6], 0 }
   0x3   :  { %14 = vsyncpa [#allocation4], 0 }
   0x4   :  { %16 = vsyncpa [#allocation4 + $0x1], 0  ;;  %s959_s18 = smov 0   ;;  %s961_s19 = smov 0  }
   0x5   :  { %s963_s20 = smov 0   ;;  %s965_s21 = smov 0  }
   0x6 LB: > { %s980_s22 = sadd.s32 4294967295, %s919_s21   ;;  %s576_s23 = sadd.s32 4294967294, %s919_s21   ;;  %s919_s21 = sphi %s965_s21, %s1211_s21   ;;  %s915_s20 = sphi %s963_s20, %s1210_s20   ;;  %s911_s19 = sphi %s961_s19, %s1209_s19   ;;  %s907_s18 = sphi %s959_s18, %s1208_s18  }
   0x7   : > { %p42_p0 = scmp.ne.s32.totalorder %s911_s19, %s907_s18  ;;  %p1190_p1 = scmp.eq.s32.totalorder %s980_s22, 0 }
   0x8   : > { %p156_p3 = scmp.eq.s32.totalorder %s576_s23, 1  ;;  %p577_p5 = scmp.ge.s32.totalorder %s919_s21, 1 }
   0x9   : > { %p989_p4 = por %p1190_p1, %p42_p0  ;;  %p163_p7 = scmp.lt.s32.totalorder %s919_s21, 3 }
   0xa   : > { %p994_p6 = por %p156_p3, %p42_p0  ;;  %s921_s27 = smov [#allocation5]  }
   0xb   : > { %s1194_s24 = scalar_select %p989_p4, 1, 0 }
   0xc   : > { %s1195_s25 = scalar_select %p994_p6, 1, 0 }
   0xd   : > { %p999_p8 = pnand %p577_p5, %p163_p7  ;;  %s175_s28 = sshll.u32 %s921_s27, 4  ;;  %s176_s28 = int_to_ptr.vmem [resolvable:$true] %s175_s28 }
   0xe   : > { %s922_s30 = smov [#allocation7]   ;;  %s782_s7 = scalar_lea.vmem %s176_s28, 2048 }
   0xf   : > { %s1196_s26 = scalar_select %p999_p8, 1, 0 }
  0x10   : > { %p710_p9 = pneg %p999_p8  ;;  %s191_s6 = sshll.u32 %s922_s30, 4  ;;  %s192_s6 = int_to_ptr.vmem [resolvable:$true] %s191_s6 }
  0x11   : > { %p783_p13 = scmp.ne.s32.totalorder %s176_s28, %s782_s7  ;;  %p790_p5 = scmp.lt.s32.totalorder %s176_s28, %s176_s28 }
  0x12   : > { %p1008_p11 = pnand %p710_p9, %p1190_p1  ;;  %p791_p7 = scmp.lt.s32.totalorder %s782_s7, %s782_s7 }
  0x14   : > { %p773_p12 = pneg %p1008_p11  ;;  %p792_p10 = por %p791_p7, %p790_p5 }
  0x16   : > { %p785_p0 = pnand %p783_p13, %p773_p12 }
  0x18   : > { %p786_p3 = pneg %p785_p0 }
  0x1a   : > { %p793_p9 = pnand %p792_p10, %p786_p3 }
  0x1c   : > { %796 = shalt.err (!%p793_p9)
}
  0x1d   : > { %s923_s8 = smov 128   ;;  %s924_s9 = smov 8  }
  0x1e   : > { %713 = dma.hbm_to_vmem [thread:$0]  (!%p1008_p11), %s1185_s1, 2048, %s176_s28, [#allocation6], %s923_s8, %s923_s8, %s924_s9  }
  0x1f   : > { %s808_s12 = scalar_lea.vmem %s192_s6, 2048  ;;  %p816_p2 = scmp.lt.s32.totalorder %s192_s6, %s192_s6 }
  0x20   : > { %p809_p1 = scmp.ne.s32.totalorder %s192_s6, %s808_s12  ;;  %p817_p6 = scmp.lt.s32.totalorder %s808_s12, %s808_s12 }
  0x22   : > { %p811_p13 = pnand %p809_p1, %p773_p12  ;;  %p818_p5 = por %p817_p6, %p816_p2 }
  0x24   : > { %p812_p0 = pneg %p811_p13 }
  0x26   : > { %p819_p10 = pnand %p818_p5, %p812_p0 }
  0x28   : > { %822 = shalt.err (!%p819_p10)
}
  0x29   : > { %716 = dma.hbm_to_vmem [thread:$0]  (!%p1008_p11), %s1187_s3, 2048, %s192_s6, [#allocation6], %s923_s8, %s923_s8, %s924_s9  }
  0x2a   : > { %s1031_s15 = sadd.s32 1, %s919_s21   ;;  %s29_s16 = sadd.s32 1, %s915_s20 }
  0x2b   : > { %s26_s17 = ssub.s32 %s919_s21, %s1031_s15  ;;  %p36_p1 = scmp.ne.s32.totalorder %s915_s20, %s911_s19 }
  0x2c   : > { %p27_p2 = scmp.eq.s32.totalorder %s26_s17, 0  ;;  %p37_p6 = scmp.eq.s32.totalorder %s919_s21, 0 }
  0x2d   : > { %p1198_p12 = scmp.eq.s32.totalorder %s980_s22, 1  ;;  %p727_p7 = scmp.lt.s32.totalorder %s919_s21, 2 }
  0x2e   : > { %s1047_s27 = scalar_select %p27_p2, %s915_s20, %s29_s16  }
  0x2f   : > { %p1041_p3 = por %p1198_p12, %p36_p1  ;;  %p38_p9 = por %p37_p6, %p36_p1 }
  0x30   : > { %s208_s28 = sand.u32 1, %s915_s20   ;;  %s582_s30 = sshll.u32 %s919_s21, 7 }
  0x31   : > { %s1199_s23 = scalar_select %p1041_p3, 1, 0 }
  0x32   : > { %s581_s29 = sshll.u32 %s208_s28, 3  ;;  %s1054_s8 = scalar_lea.hbm %s1184_s0, %s582_s30 }
  0x33   : > { %s212_s9 = scalar_lea.vmem [#allocation2], %s581_s29  ;;  %p1056_p11 = pnand %p727_p7, %p38_p9 }
  0x34   : > { %s219_s10 = sshll.u32 %s212_s9, 4  ;;  %s209_s12 = scalar_lea.sflag [#allocation3], %s208_s28  ;;  %s220_s10 = int_to_ptr.vmem [resolvable:$true] %s219_s10 }
  0x35   : > { %s823_s13 = scalar_lea.hbm %s1054_s8, 128  ;;  %p825_p0 = pneg %p1056_p11 }
  0x36   : > { %p824_p13 = scmp.ne.s32.totalorder %s1054_s8, %s823_s13  ;;  %s828_s17 = scalar_lea.hbm %s1184_s0, 256 }
  0x37   : > { %p829_p1 = scmp.lt.s32.totalorder %s1054_s8, %s1184_s0  ;;  %p830_p2 = scmp.lt.s32.totalorder %s828_s17, %s823_s13 }
  0x38   : > { %p826_p5 = pnand %p825_p0, %p824_p13 }
  0x39   : > { %p831_p6 = por %p830_p2, %p829_p1 }
  0x3a   : > { %p827_p10 = pneg %p826_p5 }
  0x3c   : > { %p832_p12 = pnand %p831_p6, %p827_p10 }
  0x3e   : > { %835 = shalt.err (!%p832_p12)
}
  0x3f   : > { %s836_s6 = scalar_lea.vmem %s220_s10, 128  ;;  %s925_s28 = smov [#allocation2]  }
  0x40   : > { %p837_p7 = scmp.ne.s32.totalorder %s220_s10, %s836_s6  ;;  %s841_s7 = sshll.u32 %s925_s28, 4  ;;  %s842_s7 = int_to_ptr.vmem [resolvable:$false] %s841_s7 }
  0x41   : > { %s843_s9 = scalar_lea.vmem %s842_s7, 256  ;;  %p844_p13 = scmp.lt.s32.totalorder %s220_s10, %s842_s7 }
  0x42   : > { %p839_p9 = pnand %p837_p7, %p825_p0  ;;  %p845_p5 = scmp.lt.s32.totalorder %s843_s9, %s836_s6 }
  0x44   : > { %p840_p3 = pneg %p839_p9  ;;  %p846_p4 = por %p845_p5, %p844_p13 }
  0x46   : > { %p847_p8 = pnand %p846_p4, %p840_p3 }
  0x48   : > { %850 = shalt.err (!%p847_p8)
}
  0x49   : > { %720 = dma.hbm_to_vmem [thread:$0]  (!%p1056_p11), %s1054_s8, 128, %s220_s10, %s209_s12  }
  0x4a   : > { %p1201_p10 = scmp.ne.s32.totalorder %s1196_s26, 0 }
  0x4b   : > { %s1077_s13 = sand.u32 (!%p1201_p10), 1, %s911_s19   ;;  %p1202_p4 = scmp.ne.s32.totalorder (!%p1201_p10), %s1194_s24, 0 }
  0x4c   : > { %228 = sbr.rel (%p1201_p10) target bundleno = 797 (0x31d), region = 40  ;;  %s584_s14 = sshll.u32 (!%p1201_p10), %s1077_s13, 3 }
  0x4d   : > { %s231_s16 = scalar_lea.sflag (!%p1201_p10), [#allocation3], %s1077_s13  ;;  %s234_s17 = scalar_lea.vmem (!%p1201_p10), [#allocation2], %s584_s14 }
  0x51   : > { %894 = dma.done.wait (%p1202_p4), %s231_s16, 128  }
  0x52   : > { %896 = vsyncadd (%p1202_p4), %s231_s16, 4294967168  ;;  %p1203_p8 = scmp.eq.s32.totalorder %s980_s22, 0 }
  0x54   : > { %898 = dma.done.wait (%p1203_p8), [#allocation6], 4096   ;;  %p1204_p3 = pmov %p1203_p8 }
  0x55   : > { %v269_v0 = vld [vmem:[%s234_s17] sm:$0xff]  ;;  %v926_v2 = vmov 0.0   ;;  %v298_v4 = vld [vmem:[#allocation5 + $0x68] sm:$0xff]  ;;  %v297_v5 = vld [vmem:[#allocation5 + $0x60] sm:$0xff]  ;;  %vm927_vm0 = vmmov 0   ;;  %s591_s11 = sshll.u32 %s980_s22, 7 }
  0x56   : > { %900 = vsyncadd (%p1204_p3), [#allocation6], 4294963200  ;;  %270 = vadd.xlane.f32.xlu0 %v269_v0  ;;  %v300_v1 = vld [vmem:[#allocation5 + $0x78] sm:$0xff]  ;;  %628 = vmatprep.subr.mxu0 %v926_v2  ;;  %v299_v3 = vld [vmem:[#allocation5 + $0x70] sm:$0xff]  ;;  %s268_s12 = scalar_lea.vmem [#allocation8], %s584_s14  ;;  %s1147_s28 = scalar_lea.hbm %s1189_s5, %s591_s11 }
  0x57   : > { %663 = vmatprep.subr.mxu1 %v926_v2  ;;  %629 = vmatpush3.msra.mxu0 %v300_v1  ;;  %v296_v10 = vld [vmem:[#allocation5 + $0x58] sm:$0xff]  ;;  %v295_v11 = vld [vmem:[#allocation5 + $0x50] sm:$0xff]  ;;  %v294_v12 = vld [vmem:[#allocation5 + $0x48] sm:$0xff]  ;;  %s487_s30 = sshll.u32 %s268_s12, 4  ;;  %s474_s7 = scalar_lea.sflag [#allocation4], %s1077_s13  ;;  %s488_s30 = int_to_ptr.vmem [resolvable:$true] %s487_s30 }
  0x58   : > { %630 = vmatprep.subr.mxu0 %v926_v2  ;;  %v293_v13 = vld [vmem:[#allocation5 + $0x40] sm:$0xff]  ;;  %v292_v14 = vld [vmem:[#allocation5 + $0x38] sm:$0xff]  ;;  %v291_v15 = vld [vmem:[#allocation5 + $0x30] sm:$0xff]  ;;  %660 = vmatprep.mubr.msk.f32.mxu0 %vm927_vm0, %v926_v2  ;;  %s851_s9 = scalar_lea.vmem %s488_s30, 128  ;;  %p1205_p0 = scmp.ne.s32.totalorder %s1199_s23, 0 }
  0x59   : > { %631 = vmatpush3.msra.mxu0 %v299_v3  ;;  %v290_v16 = vld [vmem:[#allocation5 + $0x28] sm:$0xff]  ;;  %695 = vmatprep.mubr.msk.f32.mxu1 %vm927_vm0, %v926_v2  ;;  %v289_v17 = vld [vmem:[#allocation5 + $0x20] sm:$0xff]  ;;  %v288_v18 = vld [vmem:[#allocation5 + $0x18] sm:$0xff]  ;;  %p852_p11 = scmp.ne.s32.totalorder %s488_s30, %s851_s9  ;;  %s928_s22 = smov [#allocation8]  }
  0x5a   : > { %632 = vmatprep.subr.mxu0 %v926_v2  ;;  %v287_v19 = vld [vmem:[#allocation5 + $0x10] sm:$0xff]  ;;  %v286_v20 = vld [vmem:[#allocation5 + $0x8] sm:$0xff]  ;;  %v285_v21 = vld [vmem:[#allocation5] sm:$0xff]  ;;  %s855_s16 = sshll.u32 %s928_s22, 4  ;;  %s856_s16 = int_to_ptr.vmem [resolvable:$false] %s855_s16 }
  0x5b   : > { %633 = vmatpush3.msra.mxu0 %v298_v4  ;;  %v394_v22 = vld [vmem:[#allocation7 + $0x78] sm:$0xff]  ;;  %v393_v23 = vld [vmem:[#allocation7 + $0x70] sm:$0xff]  ;;  %v392_v24 = vld [vmem:[#allocation7 + $0x68] sm:$0xff]  ;;  %p853_p1 = pnand %p852_p11, %p1205_p0  ;;  %s857_s14 = scalar_lea.vmem %s856_s16, 256 }
  0x5c   : > { %634 = vmatprep.subr.mxu0 %v926_v2  ;;  %664 = vmatpush3.msra.mxu1 %v394_v22  ;;  %v391_v25 = vld [vmem:[#allocation7 + $0x60] sm:$0xff]  ;;  %v390_v26 = vld [vmem:[#allocation7 + $0x58] sm:$0xff]  ;;  %v389_v27 = vld [vmem:[#allocation7 + $0x50] sm:$0xff]  ;;  %p858_p6 = scmp.lt.s32.totalorder %s488_s30, %s856_s16  ;;  %p859_p12 = scmp.lt.s32.totalorder %s857_s14, %s851_s9 }
  0x5d   : > { %635 = vmatpush3.msra.mxu0 %v297_v5  ;;  %665 = vmatprep.subr.mxu1 %v926_v2  ;;  %v388_v28 = vld [vmem:[#allocation7 + $0x48] sm:$0xff]  ;;  %v387_v29 = vld [vmem:[#allocation7 + $0x40] sm:$0xff]  ;;  %v386_v30 = vld [vmem:[#allocation7 + $0x38] sm:$0xff]  ;;  %p854_p2 = pneg %p853_p1 }
  0x5e   : > { %636 = vmatprep.subr.mxu0 %v926_v2  ;;  %666 = vmatpush3.msra.mxu1 %v393_v23  ;;  %v385_v31 = vld [vmem:[#allocation7 + $0x30] sm:$0xff]  ;;  %v384_v32 = vld [vmem:[#allocation7 + $0x28] sm:$0xff]  ;;  %v383_v33 = vld [vmem:[#allocation7 + $0x20] sm:$0xff]  ;;  %p860_p7 = por %p859_p12, %p858_p6 }
  0x5f   : > { %637 = vmatpush3.msra.mxu0 %v296_v10  ;;  %667 = vmatprep.subr.mxu1 %v926_v2  ;;  %v382_v34 = vld [vmem:[#allocation7 + $0x18] sm:$0xff]  ;;  %v381_v44 = vld [vmem:[#allocation7 + $0x10] sm:$0xff]  ;;  %v380_v45 = vld [vmem:[#allocation7 + $0x8] sm:$0xff] }
  0x60   : > { %638 = vmatprep.subr.mxu0 %v926_v2  ;;  %668 = vmatpush3.msra.mxu1 %v392_v24  ;;  %v379_v46 = vld [vmem:[#allocation7] sm:$0xff]  ;;  %v588_v47 = vld [vmem:[%s1186_s2] ss:$0 sm:$0xff]  ;;  %p861_p9 = pnand %p860_p7, %p854_p2 }
  0x61   : > { %639 = vmatpush3.msra.mxu0 %v295_v11  ;;  %669 = vmatprep.subr.mxu1 %v926_v2  ;;  %v589_v52 = vld [vmem:[%s1188_s4] ss:$0 sm:$0xff] }
  0x62   : > { %640 = vmatprep.subr.mxu0 %v926_v2  ;;  %670 = vmatpush3.msra.mxu1 %v391_v25 }
  0x63   : > { %641 = vmatpush3.msra.mxu0 %v294_v12  ;;  %671 = vmatprep.subr.mxu1 %v926_v2 }
  0x64   : > { %642 = vmatprep.subr.mxu0 %v926_v2  ;;  %672 = vmatpush3.msra.mxu1 %v390_v26 }
  0x65   : > { %643 = vmatpush3.msra.mxu0 %v293_v13  ;;  %673 = vmatprep.subr.mxu1 %v926_v2 }
  0x66   : > { %644 = vmatprep.subr.mxu0 %v926_v2  ;;  %674 = vmatpush3.msra.mxu1 %v389_v27 }
  0x67   : > { %645 = vmatpush3.msra.mxu0 %v292_v14  ;;  %675 = vmatprep.subr.mxu1 %v926_v2 }
  0x68   : > { %646 = vmatprep.subr.mxu0 %v926_v2  ;;  %676 = vmatpush3.msra.mxu1 %v388_v28 }
  0x69   : > { %647 = vmatpush3.msra.mxu0 %v291_v15  ;;  %677 = vmatprep.subr.mxu1 %v926_v2 }
  0x6a   : > { %648 = vmatprep.subr.mxu0 %v926_v2  ;;  %678 = vmatpush3.msra.mxu1 %v387_v29 }
  0x6b   : > { %649 = vmatpush3.msra.mxu0 %v290_v16  ;;  %679 = vmatprep.subr.mxu1 %v926_v2 }
  0x6c   : > { %650 = vmatprep.subr.mxu0 %v926_v2  ;;  %680 = vmatpush3.msra.mxu1 %v386_v30 }
  0x6d   : > { %651 = vmatpush3.msra.mxu0 %v289_v17  ;;  %681 = vmatprep.subr.mxu1 %v926_v2 }
  0x6e   : > { %652 = vmatprep.subr.mxu0 %v926_v2  ;;  %682 = vmatpush3.msra.mxu1 %v385_v31 }
  0x6f   : > { %653 = vmatpush3.msra.mxu0 %v288_v18  ;;  %683 = vmatprep.subr.mxu1 %v926_v2 }
  0x70   : > { %654 = vmatprep.subr.mxu0 %v926_v2  ;;  %684 = vmatpush3.msra.mxu1 %v384_v32 }
  0x71   : > { %655 = vmatpush3.msra.mxu0 %v287_v19  ;;  %685 = vmatprep.subr.mxu1 %v926_v2 }
  0x72   : > { %656 = vmatprep.subr.mxu0 %v926_v2  ;;  %686 = vmatpush3.msra.mxu1 %v383_v33 }
  0x73   : > { %657 = vmatpush3.msra.mxu0 %v286_v20  ;;  %687 = vmatprep.subr.mxu1 %v926_v2 }
  0x74   : > { %658 = vmatprep.subr.mxu0 %v926_v2  ;;  %688 = vmatpush3.msra.mxu1 %v382_v34 }
  0x75   : > { %659 = vmatpush3.msra.mxu0 %v285_v21  ;;  %689 = vmatprep.subr.mxu1 %v926_v2 }
  0x76   : > { %690 = vmatpush3.msra.mxu1 %v381_v44 }
  0x77   : > { %691 = vmatprep.subr.mxu1 %v926_v2 }
  0x78   : > { %692 = vmatpush3.msra.mxu1 %v380_v45 }
  0x79   : > { %693 = vmatprep.subr.mxu1 %v926_v2 }
  0x7a   : > { %694 = vmatpush3.msra.mxu1 %v379_v46 }
  0xdf   : > { %v271_v6 = vpop.xlane.xlu0 %270 }
  0xe0   : > { %v1097_v7 = vmul.f32 0.03125, %v271_v6 }
  0xe2   : > { %v1100_v8 = vsub.f32 %v269_v0, %v1097_v7  ;;  %v277_v35 = vmul.f32 %v1097_v7, %v1097_v7 }
  0xe4   : > { %v274_v9 = vmul.f32 %v1100_v8, %v1100_v8  ;;  %v278_v36 = vmul.f32 96.0, %v277_v35 }
  0xe6   : > { %275 = vadd.xlane.f32.xlu0 %v274_v9 }
 0x16f   : > { %v276_v37 = vpop.xlane.xlu0 %275 }
 0x170   : > { %v279_v38 = vsub.f32 %v276_v37, %v278_v36 }
 0x172   : > { %v280_v39 = vmul.f32 0.03125, %v279_v38 }
 0x174   : > { %v281_v40 = vmax.f32 %v280_v39, 0.0 }
 0x176   : > { %v282_v41 = vadd.f32 1e-05, %v281_v40 }
 0x178   : > { %769 = vrsqrt.f32 %v282_v41 }
 0x185   : > { %v770_v42 = vpop.eup %769 }
 0x186   : > { %v284_v43 = vmul.f32 %v770_v42, %v1100_v8 }
 0x188   : > { %661 = vmatmul.mubr.f32.vlgmr.msra.gmra.mxu0 %v284_v43 }
 0x248   : > { %v374_v48 = vpop.f32.mrf.mxu0 }
 0x249   : > { %v375_v49 = vadd.f32 %v588_v47, %v374_v48 }
 0x24a   : > { %v662_v50 = vpop.f32.mrf.mxu0 }
 0x24b   : > { %v378_v51 = vmax.f32 %v375_v49, 0.0 }
 0x24d   : > { %696 = vmatmul.mubr.f32.vlgmr.msra.gmra.mxu1 %v378_v51 }
 0x30d   : > { %v468_v53 = vpop.f32.mrf.mxu1 }
 0x30e   : > { %v469_v54 = vadd.f32 %v589_v52, %v468_v53 }
 0x30f   : > { %v697_v55 = vpop.f32.mrf.mxu1 }
 0x310   : > { %472 = vst [vmem:[%s268_s12] sm:$0xff] %v469_v54 }
 0x311   : > { %864 = shalt.err (!%p861_p9)
}
 0x312   : > { %s865_s17 = scalar_lea.hbm %s1147_s28, 128  ;;  %s869_s26 = scalar_lea.hbm %s1189_s5, 256 }
 0x313   : > { %p866_p13 = scmp.ne.s32.totalorder %s1147_s28, %s865_s17  ;;  %p870_p4 = scmp.lt.s32.totalorder %s1147_s28, %s1189_s5 }
 0x314   : > { %p871_p8 = scmp.lt.s32.totalorder %s869_s26, %s865_s17 }
 0x315   : > { %p867_p5 = pnand %p866_p13, %p1205_p0 }
 0x316   : > { %p872_p3 = por %p871_p8, %p870_p4 }
 0x317   : > { %p868_p10 = pneg %p867_p5 }
 0x319   : > { %p873_p11 = pnand %p872_p3, %p868_p10 }
 0x31b   : > { %876 = shalt.err (!%p873_p11)
}
 0x31c   : > { %708 = dma.vmem_to_hbm [thread:$0]  (%p1205_p0), %s488_s30, 128, %s1147_s28, %s474_s7  }
 0x31d PF: > { %s499_s11 = sand.u32 1, %s907_s18   ;;  %p1206_p1 = scmp.ne.s32.totalorder %s1195_s25, 0 }
 0x31e   : > { %p1207_p2 = scmp.ge.s32.totalorder %s919_s21, 2  ;;  %s500_s12 = scalar_lea.sflag [#allocation4], %s499_s11 }
 0x320   : > { %p722_p6 = pnand %p1207_p2, %p1206_p1 }
 0x322   : > { %p723_p12 = pneg %p722_p6 }
 0x324   : > { %902 = dma.done.wait (%p723_p12), %s500_s12, 128  }
 0x325   : > { %904 = vsyncadd (%p723_p12), %s500_s12, 4294967168  ;;  %p19_p7 = scmp.ge.s32.totalorder %s1031_s15, 4   ;;  %s1208_s18 = smov %s911_s19 }
 0x326   : > { %s1209_s19 = smov %s915_s20  ;;  %s1210_s20 = smov %s1047_s27 }
 0x327   : > { %s1211_s21 = smov %s1031_s15  ;;  %21 = sbr.rel (!%p19_p7) target bundleno = 6 (0x6), region = 93 }
 0x32c   :  { %505 = vsyncpa [#allocation3], 1 }
 0x32d   :  { %507 = vsyncpa [#allocation3 + $0x1], 1 }
 0x32e   :  { %508 = vsyncpa [#allocation6], 1 }
 0x32f   :  { %509 = vsyncpa [#allocation4], 1 }
 0x330   :  { %511 = vsyncpa [#allocation4 + $0x1], 1 }

</bundles_post_ra>
